<compile_context>
chip_gen: v6e
topology: v6e:2x2x1
jax: 0.10.0
libtpu: 0.0.40
codegen_flags: <defaults>
</compile_context>

<pallas_src>
import jax
import jax.numpy as jnp
from jax import lax
from jax.experimental import pallas as pl
from jax.experimental.pallas import tpu as pltpu


def same_padding(kernel):
    pad_val = (kernel - 1) / 2
    if kernel % 2 == 0:
        return (int(pad_val - 0.5), int(pad_val + 0.5))
    return int(pad_val)


def make_kernel(*, NB, T, S, ML, L, Cout, K1, K2, P2, K3, P3):
    """L = NB*S lanes; batch b's valid columns are [b*S+ML, b*S+ML+T)."""

    def kernel(x_ref, w1_ref, b1_ref, w2_ref, b2_ref, w3_ref, b3_ref,
               out_ref, h_scr):
        # Valid-column mask over the packed (batch-in-lanes) axis.  Pad columns inside
        # each segment must read back as exact zeros for the next conv stage.
        cols = lax.broadcasted_iota(jnp.int32, (1, L), 1)
        valid = cols < 0                                     # all-False, (1, L)
        for b in range(NB):                                  # NB is small and static
            lo = b * S + ML
            valid = jnp.logical_or(
                valid, jnp.logical_and(cols >= lo, cols < lo + T))

        h_scr[...] = jnp.zeros_like(h_scr)

        # ---- conv1 (K1 x F) + the 1 x F shortcut (folded as tap P1L of rows [Cout:))
        #      as K1 accumulating MXU matmuls; tap RHS = offset load of x_ref.
        acc = jnp.zeros((2 * Cout, L), jnp.float32)
        for dh in range(K1):
            acc = acc + jnp.dot(w1_ref[dh], x_ref[0, :, dh:dh + L],
                                preferred_element_type=jnp.float32)
        y1 = acc + b1_ref[...]                               # BN folded -> bias only
        h = jnp.where(valid, jnp.maximum(y1[:Cout], 0.0), 0.0)   # conv1->BN1->ReLU
        sc = y1[Cout:]                                       # shortcut -> BN_shortcut

        # ---- conv2 + BN2 + ReLU: taps sliced straight from a zero-padded VMEM scratch
        #      (no pad / im2col concatenation materialised).
        h_scr[:, P2:P2 + L] = h.astype(h_scr.dtype)
        acc = jnp.zeros((Cout, L), jnp.float32)
        for dh in range(K2):
            acc = acc + jnp.dot(w2_ref[dh], h_scr[:, dh:dh + L],
                                preferred_element_type=jnp.float32)
        h2 = jnp.where(valid, jnp.maximum(acc + b2_ref[...], 0.0), 0.0)

        # ---- conv3 + BN3
        h_scr[:, P3:P3 + L] = h2.astype(h_scr.dtype)
        acc = jnp.zeros((Cout, L), jnp.float32)
        for dh in range(K3):
            acc = acc + jnp.dot(w3_ref[dh], h_scr[:, dh:dh + L],
                                preferred_element_type=jnp.float32)
        y3 = acc + b3_ref[...]

        # ---- residual add + final ReLU; emit bf16 (halves output HBM bytes).
        out_ref[0] = jnp.maximum(y3 + sc, 0.0).astype(out_ref.dtype)

    return kernel


def resnet_block_pallas(x, params, num_kernels1, num_kernels2):
    B, Cin, T, F = x.shape
    K1, K2, K3 = num_kernels1
    assert F == num_kernels2
    Cout = params['w1'].shape[0]
    CinF = Cin * F
    eps = 1e-5

    p1 = same_padding(K1)
    assert isinstance(p1, tuple), "module's zero_pad requires an even first kernel"
    P1L, P1R = p1
    # PyTorch passes same_padding(K) straight to Conv2d's symmetric `padding`,
    # which only keeps the time length when K2/K3 are odd.
    assert K2 % 2 == 1 and K3 % 2 == 1, "conv2/conv3 kernels must be odd"
    P2 = same_padding(K2)
    P3 = same_padding(K3)

    # Per-batch segment geometry on the packed lane axis.
    ML = max(P1L, P2, P3)            # left zero margin inside each segment
    MR = max(P1R, P2, P3)            # right zero margin
    S = ML + T + MR                  # segment length per batch element

    # Pack NB batch elements per grid step into the lane axis (largest divisor of B
    # with a modest packed width).  At the tested size NB == B -> single grid step.
    NB = 1
    for cand in range(1, B + 1):
        if B % cand == 0 and cand * S <= 2048:
            NB = cand
    NT = B // NB
    L = NB * S
    Lx = L + (K1 - 1)                # + global halo so conv1 tap slices start >= 0

    # ---- activations: (B,Cin,T,F) -> (NT, Cin*F, NB*S + halo), zeros in margins, bf16.
    # One XLA fusion (transpose + reshape + pad + cast).
    x_ct = jnp.transpose(x, (0, 1, 3, 2)).reshape(B, CinF, T)
    x_seg = jnp.pad(x_ct, ((0, 0), (0, 0), (ML, MR)))                      # (B,CinF,S)
    x_til = jnp.transpose(x_seg.reshape(NT, NB, CinF, S), (0, 2, 1, 3))    # (NT,CinF,NB,S)
    x_til = x_til.reshape(NT, CinF, L)
    x_long = jnp.pad(x_til, ((0, 0), (0, 0), (P1L, P1R))).astype(jnp.bfloat16)

    # ---- fold BatchNorm (running/inference stats) into weights + per-channel bias.
    def bn_scale_bias(conv_b, bn_stats):
        gamma, beta, mean, var = bn_stats
        scale = gamma / jnp.sqrt(var + eps)
        bias = (conv_b - mean) * scale + beta
        return scale, bias

    s1, bias1 = bn_scale_bias(params['b1'], params['bn1'])
    s2, bias2 = bn_scale_bias(params['b2'], params['bn2'])
    s3, bias3 = bn_scale_bias(params['b3'], params['bn3'])
    ssc, biassc = bn_scale_bias(params['bsc'], params['bnsc'])

    # conv1 per-tap weights (K1, 2*Cout, CinF); shortcut folded as tap P1L of rows [Cout:).
    w1_taps = (jnp.transpose(params['w1'], (2, 0, 1, 3)).reshape(K1, Cout, CinF)
               * s1[None, :, None])
    wsc = params['wsc'][:, :, 0, :].reshape(Cout, CinF) * ssc[:, None]
    w1c = jnp.zeros((K1, 2 * Cout, CinF), jnp.float32)
    w1c = w1c.at[:, :Cout, :].set(w1_taps).at[P1L, Cout:, :].set(wsc)
    w1c = w1c.astype(jnp.bfloat16)
    b1c = jnp.concatenate([bias1, biassc])[:, None].astype(jnp.float32)

    # conv2/conv3: after conv1 the W axis is 1, so only the centre W column of the
    # square kernel touches real data -> per-tap weights (K, Cout, Cout), BN folded.
    w2c = (jnp.transpose(params['w2'][:, :, :, P2], (2, 0, 1))
           * s2[None, :, None]).astype(jnp.bfloat16)
    w3c = (jnp.transpose(params['w3'][:, :, :, P3], (2, 0, 1))
           * s3[None, :, None]).astype(jnp.bfloat16)
    b2c = bias2[:, None].astype(jnp.float32)
    b3c = bias3[:, None].astype(jnp.float32)

    kernel = make_kernel(NB=NB, T=T, S=S, ML=ML, L=L, Cout=Cout,
                         K1=K1, K2=K2, P2=P2, K3=K3, P3=P3)

    def const_spec(shape):
        # Index-invariant blocks (weights / biases): same block every grid step.
        return pl.BlockSpec(shape, lambda i: (0,) * len(shape))

    Lbuf = L + max(K2, K3) - 1
    out_long = pl.pallas_call(
        kernel,
        out_shape=jax.ShapeDtypeStruct((NT, Cout, L), jnp.bfloat16),
        grid=(NT,),
        in_specs=[pl.BlockSpec((1, CinF, Lx), lambda i: (i, 0, 0)),
                  const_spec((K1, 2 * Cout, CinF)),
                  const_spec((2 * Cout, 1)),
                  const_spec((K2, Cout, Cout)),
                  const_spec((Cout, 1)),
                  const_spec((K3, Cout, Cout)),
                  const_spec((Cout, 1))],
        out_specs=pl.BlockSpec((1, Cout, L), lambda i: (i, 0, 0)),
        scratch_shapes=[pltpu.VMEM((Cout, Lbuf), jnp.bfloat16)],
        compiler_params=pltpu.CompilerParams(
            dimension_semantics=("parallel",)),     # megacore-shardable batch tiles
    )(x_long, w1c, b1c, w2c, b2c, w3c, b3c)

    # Extract valid columns and restore the PyTorch NCHW convention (B, Cout, T, 1).
    out = out_long.reshape(NT, Cout, NB, S)[:, :, :, ML:ML + T]
    out = jnp.transpose(out, (0, 2, 1, 3)).reshape(B, Cout, T)
    return out[:, :, :, None]


def resnet_block_reference(x, params, num_kernels1, num_kernels2):
    """Pure-JAX/XLA reference mirroring the PyTorch forward (inference-mode BN)."""
    K1, K2, K3 = num_kernels1
    P1L, P1R = same_padding(K1)
    P2 = same_padding(K2)
    P3 = same_padding(K3)
    dn = ('NCHW', 'OIHW', 'NCHW')
    eps = 1e-5

    def bn(y, stats):
        g, b, m, v = stats
        inv = (g / jnp.sqrt(v + eps))[None, :, None, None]
        return (y - m[None, :, None, None]) * inv + b[None, :, None, None]

    def conv(y, w, b, pad):
        y = lax.conv_general_dilated(y, w, (1, 1), pad, dimension_numbers=dn)
        return y + b[None, :, None, None]

    h = conv(x, params['w1'], params['b1'], ((P1L, P1R), (0, 0)))
    h = jax.nn.relu(bn(h, params['bn1']))
    h = conv(h, params['w2'], params['b2'], ((P2, P2), (P2, P2)))
    h = jax.nn.relu(bn(h, params['bn2']))
    h = conv(h, params['w3'], params['b3'], ((P3, P3), (P3, P3)))
    h = bn(h, params['bn3'])
    sc = conv(x, params['wsc'], params['bsc'], ((0, 0), (0, 0)))
    sc = bn(sc, params['bnsc'])
    return jax.nn.relu(h + sc)


if __name__ == "__main__":
    B, Cin, Cout, T, F = 2, 4, 8, 16, 16
    num_kernels1 = (4, 5, 3)   # first kernel even (module requirement), others odd
    num_kernels2 = F

    key = jax.random.PRNGKey(0)
    ks = jax.random.split(key, 16)

    def bn_params(k):
        kg, kb, km, kv = jax.random.split(k, 4)
        gamma = 1.0 + 0.1 * jax.random.normal(kg, (Cout,), jnp.float32)
        beta = 0.1 * jax.random.normal(kb, (Cout,), jnp.float32)
        mean = 0.1 * jax.random.normal(km, (Cout,), jnp.float32)
        var = jax.random.uniform(kv, (Cout,), jnp.float32, minval=0.5, maxval=1.5)
        return (gamma, beta, mean, var)

    params = {
        'w1': 0.1 * jax.random.normal(ks[0], (Cout, Cin, num_kernels1[0], num_kernels2), jnp.float32),
        'b1': 0.1 * jax.random.normal(ks[1], (Cout,), jnp.float32),
        'w2': 0.1 * jax.random.normal(ks[2], (Cout, Cout, num_kernels1[1], num_kernels1[1]), jnp.float32),
        'b2': 0.1 * jax.random.normal(ks[3], (Cout,), jnp.float32),
        'w3': 0.1 * jax.random.normal(ks[4], (Cout, Cout, num_kernels1[2], num_kernels1[2]), jnp.float32),
        'b3': 0.1 * jax.random.normal(ks[5], (Cout,), jnp.float32),
        'wsc': 0.1 * jax.random.normal(ks[6], (Cout, Cin, 1, num_kernels2), jnp.float32),
        'bsc': 0.1 * jax.random.normal(ks[7], (Cout,), jnp.float32),
        'bn1': bn_params(ks[8]),
        'bn2': bn_params(ks[9]),
        'bn3': bn_params(ks[10]),
        'bnsc': bn_params(ks[11]),
    }

    x = jax.random.normal(ks[12], (B, Cin, T, F), jnp.float32)

    out = resnet_block_pallas(x, params, num_kernels1, num_kernels2)
    out = jax.block_until_ready(out)

    ref = resnet_block_reference(x, params, num_kernels1, num_kernels2)
    assert out.shape == (B, Cout, T, 1), out.shape
    # bf16 matmul operands, bf16 inter-stage activations and a bf16 output store
    # (f32 accumulation throughout) -> expect a few 1e-2 absolute error vs the
    # pure-f32 XLA reference.
    out_f32 = out.astype(jnp.float32)
    err = float(jnp.max(jnp.abs(out_f32 - ref)))
    assert jnp.allclose(out_f32, ref, atol=7.5e-2, rtol=7.5e-2), f"max abs err = {err}"

    print("KERNEL_OK")
</pallas_src>

<mosaic_0001>
module attributes {stable_mosaic.version = 11 : i64} {
  func.func @kernel(%arg0: i32, %arg1: memref<1x64x43xbf16, #tpu.memory_space<vmem>>, %arg2: memref<4x16x64xbf16, #tpu.memory_space<vmem>>, %arg3: memref<16x1xf32, #tpu.memory_space<vmem>>, %arg4: memref<5x8x8xbf16, #tpu.memory_space<vmem>>, %arg5: memref<8x1xf32, #tpu.memory_space<vmem>>, %arg6: memref<3x8x8xbf16, #tpu.memory_space<vmem>>, %arg7: memref<8x1xf32, #tpu.memory_space<vmem>>, %arg8: memref<1x8x40xbf16, #tpu.memory_space<vmem>>, %arg9: memref<8x44xbf16, #tpu.memory_space<vmem>>) attributes {dimension_semantics = [#tpu.dimension_semantics<parallel>], iteration_bounds = array<i64: 1>, scalar_prefetch = 0 : i64, scratch_operands = 1 : i64, tpu.core_type = #tpu.core_type<tc>, window_params = [{transform_indices = @transform_0, window_bounds = array<i64: 1, 64, 43>}, {pipeline_mode = #tpu.pipeline_mode<synchronous>, transform_indices = @transform_1, window_bounds = array<i64: 4, 16, 64>}, {pipeline_mode = #tpu.pipeline_mode<synchronous>, transform_indices = @transform_2, window_bounds = array<i64: 16, 1>}, {pipeline_mode = #tpu.pipeline_mode<synchronous>, transform_indices = @transform_3, window_bounds = array<i64: 5, 8, 8>}, {pipeline_mode = #tpu.pipeline_mode<synchronous>, transform_indices = @transform_4, window_bounds = array<i64: 8, 1>}, {pipeline_mode = #tpu.pipeline_mode<synchronous>, transform_indices = @transform_5, window_bounds = array<i64: 3, 8, 8>}, {pipeline_mode = #tpu.pipeline_mode<synchronous>, transform_indices = @transform_6, window_bounds = array<i64: 8, 1>}, {transform_indices = @transform_7, window_bounds = array<i64: 1, 8, 40>}]} {
    %0 = tpu.iota {dimensions = array<i32: 1>} : vector<1x40xi32>
    %c0_i32 = arith.constant 0 : i32
    %1 = vector.broadcast %c0_i32 : i32 to vector<1x40xi32>
    %2 = arith.cmpi slt, %0, %1 : vector<1x40xi32>
    %c2_i32 = arith.constant 2 : i32
    %3 = vector.broadcast %c2_i32 : i32 to vector<1x40xi32>
    %4 = arith.cmpi sge, %0, %3 : vector<1x40xi32>
    %c18_i32 = arith.constant 18 : i32
    %5 = vector.broadcast %c18_i32 : i32 to vector<1x40xi32>
    %6 = arith.cmpi slt, %0, %5 : vector<1x40xi32>
    %7 = arith.andi %4, %6 : vector<1x40xi1>
    %8 = arith.ori %2, %7 : vector<1x40xi1>
    %c22_i32 = arith.constant 22 : i32
    %9 = vector.broadcast %c22_i32 : i32 to vector<1x40xi32>
    %10 = arith.cmpi sge, %0, %9 : vector<1x40xi32>
    %c38_i32 = arith.constant 38 : i32
    %11 = vector.broadcast %c38_i32 : i32 to vector<1x40xi32>
    %12 = arith.cmpi slt, %0, %11 : vector<1x40xi32>
    %13 = arith.andi %10, %12 : vector<1x40xi1>
    %14 = arith.ori %8, %13 : vector<1x40xi1>
    %cst = arith.constant 0.000000e+00 : bf16
    %15 = vector.broadcast %cst : bf16 to vector<8x44xbf16>
    %c0 = arith.constant 0 : index
    %c0_0 = arith.constant 0 : index
    %16 = vector.load %arg9[%c0, %c0_0] : memref<8x44xbf16, #tpu.memory_space<vmem>>, vector<8x44xbf16>
    tpu.vector_store %arg9[%c0, %c0_0], %15 {strides = array<i32>} : memref<8x44xbf16, #tpu.memory_space<vmem>>, vector<8x44xbf16>,
    %cst_1 = arith.constant 0.000000e+00 : f32
    %17 = vector.broadcast %cst_1 : f32 to vector<16x40xf32>
    %c0_2 = arith.constant 0 : index
    %c0_3 = arith.constant 0 : index
    %c0_4 = arith.constant 0 : index
    %18 = vector.load %arg2[%c0_2, %c0_3, %c0_4] : memref<4x16x64xbf16, #tpu.memory_space<vmem>>, vector<1x16x64xbf16>
    %19 = vector.shape_cast %18 : vector<1x16x64xbf16> to vector<16x64xbf16>
    %c0_5 = arith.constant 0 : index
    %c0_6 = arith.constant 0 : index
    %c0_7 = arith.constant 0 : index
    %20 = vector.load %arg1[%c0_5, %c0_6, %c0_7] : memref<1x64x43xbf16, #tpu.memory_space<vmem>>, vector<1x64x40xbf16>
    %21 = vector.shape_cast %20 : vector<1x64x40xbf16> to vector<64x40xbf16>
    %cst_8 = arith.constant dense<0.000000e+00> : vector<16x40xf32>
    %22 = tpu.matmul %19, %21, %cst_8 {dimension_numbers = #tpu.dot_dimension_numbers<[1], [0], [0], [1], [0, 0, 1, 1], [], []>} : vector<16x64xbf16>, vector<64x40xbf16>, vector<16x40xf32> -> vector<16x40xf32>
    %23 = arith.addf %17, %22 : vector<16x40xf32>
    %c1 = arith.constant 1 : index
    %c0_9 = arith.constant 0 : index
    %c0_10 = arith.constant 0 : index
    %24 = vector.load %arg2[%c1, %c0_9, %c0_10] : memref<4x16x64xbf16, #tpu.memory_space<vmem>>, vector<1x16x64xbf16>
    %25 = vector.shape_cast %24 : vector<1x16x64xbf16> to vector<16x64xbf16>
    %c0_11 = arith.constant 0 : index
    %c0_12 = arith.constant 0 : index
    %c1_13 = arith.constant 1 : index
    %26 = vector.load %arg1[%c0_11, %c0_12, %c1_13] : memref<1x64x43xbf16, #tpu.memory_space<vmem>>, vector<1x64x40xbf16>
    %27 = vector.shape_cast %26 : vector<1x64x40xbf16> to vector<64x40xbf16>
    %cst_14 = arith.constant dense<0.000000e+00> : vector<16x40xf32>
    %28 = tpu.matmul %25, %27, %cst_14 {dimension_numbers = #tpu.dot_dimension_numbers<[1], [0], [0], [1], [0, 0, 1, 1], [], []>} : vector<16x64xbf16>, vector<64x40xbf16>, vector<16x40xf32> -> vector<16x40xf32>
    %29 = arith.addf %23, %28 : vector<16x40xf32>
    %c2 = arith.constant 2 : index
    %c0_15 = arith.constant 0 : index
    %c0_16 = arith.constant 0 : index
    %30 = vector.load %arg2[%c2, %c0_15, %c0_16] : memref<4x16x64xbf16, #tpu.memory_space<vmem>>, vector<1x16x64xbf16>
    %31 = vector.shape_cast %30 : vector<1x16x64xbf16> to vector<16x64xbf16>
    %c0_17 = arith.constant 0 : index
    %c0_18 = arith.constant 0 : index
    %c2_19 = arith.constant 2 : index
    %32 = vector.load %arg1[%c0_17, %c0_18, %c2_19] : memref<1x64x43xbf16, #tpu.memory_space<vmem>>, vector<1x64x40xbf16>
    %33 = vector.shape_cast %32 : vector<1x64x40xbf16> to vector<64x40xbf16>
    %cst_20 = arith.constant dense<0.000000e+00> : vector<16x40xf32>
    %34 = tpu.matmul %31, %33, %cst_20 {dimension_numbers = #tpu.dot_dimension_numbers<[1], [0], [0], [1], [0, 0, 1, 1], [], []>} : vector<16x64xbf16>, vector<64x40xbf16>, vector<16x40xf32> -> vector<16x40xf32>
    %35 = arith.addf %29, %34 : vector<16x40xf32>
    %c3 = arith.constant 3 : index
    %c0_21 = arith.constant 0 : index
    %c0_22 = arith.constant 0 : index
    %36 = vector.load %arg2[%c3, %c0_21, %c0_22] : memref<4x16x64xbf16, #tpu.memory_space<vmem>>, vector<1x16x64xbf16>
    %37 = vector.shape_cast %36 : vector<1x16x64xbf16> to vector<16x64xbf16>
    %c0_23 = arith.constant 0 : index
    %c0_24 = arith.constant 0 : index
    %c3_25 = arith.constant 3 : index
    %38 = vector.load %arg1[%c0_23, %c0_24, %c3_25] : memref<1x64x43xbf16, #tpu.memory_space<vmem>>, vector<1x64x40xbf16>
    %39 = vector.shape_cast %38 : vector<1x64x40xbf16> to vector<64x40xbf16>
    %cst_26 = arith.constant dense<0.000000e+00> : vector<16x40xf32>
    %40 = tpu.matmul %37, %39, %cst_26 {dimension_numbers = #tpu.dot_dimension_numbers<[1], [0], [0], [1], [0, 0, 1, 1], [], []>} : vector<16x64xbf16>, vector<64x40xbf16>, vector<16x40xf32> -> vector<16x40xf32>
    %41 = arith.addf %35, %40 : vector<16x40xf32>
    %c0_27 = arith.constant 0 : index
    %c0_28 = arith.constant 0 : index
    %42 = vector.load %arg3[%c0_27, %c0_28] : memref<16x1xf32, #tpu.memory_space<vmem>>, vector<16x1xf32>
    %43 = vector.broadcast %42 : vector<16x1xf32> to vector<16x40xf32>
    %44 = arith.addf %41, %43 : vector<16x40xf32>
    %45 = vector.extract_strided_slice %44 {offsets = [0, 0], sizes = [8, 40], strides = [1, 1]} : vector<16x40xf32> to vector<8x40xf32>
    %cst_29 = arith.constant 0.000000e+00 : f32
    %46 = vector.broadcast %cst_29 : f32 to vector<8x40xf32>
    %47 = arith.maximumf %45, %46 : vector<8x40xf32>
    %cst_30 = arith.constant 0.000000e+00 : f32
    %48 = vector.shape_cast %14 : vector<1x40xi1> to vector<1x40xi1>
    %49 = vector.broadcast %48 : vector<1x40xi1> to vector<8x40xi1>
    %50 = vector.broadcast %cst_30 : f32 to vector<8x40xf32>
    %51 = arith.select %49, %47, %50 : vector<8x40xi1>, vector<8x40xf32>
    %52 = vector.extract_strided_slice %44 {offsets = [8, 0], sizes = [8, 40], strides = [1, 1]} : vector<16x40xf32> to vector<8x40xf32>
    %53 = arith.truncf %51 : vector<8x40xf32> to vector<8x40xbf16>
    %c0_31 = arith.constant 0 : index
    %c2_32 = arith.constant 2 : index
    %54 = vector.load %arg9[%c0_31, %c2_32] : memref<8x44xbf16, #tpu.memory_space<vmem>>, vector<8x40xbf16>
    tpu.vector_store %arg9[%c0_31, %c2_32], %53 {strides = array<i32>} : memref<8x44xbf16, #tpu.memory_space<vmem>>, vector<8x40xbf16>,
    %cst_33 = arith.constant 0.000000e+00 : f32
    %55 = vector.broadcast %cst_33 : f32 to vector<8x40xf32>
    %c0_34 = arith.constant 0 : index
    %c0_35 = arith.constant 0 : index
    %c0_36 = arith.constant 0 : index
    %56 = vector.load %arg4[%c0_34, %c0_35, %c0_36] : memref<5x8x8xbf16, #tpu.memory_space<vmem>>, vector<1x8x8xbf16>
    %57 = vector.shape_cast %56 : vector<1x8x8xbf16> to vector<8x8xbf16>
    %c0_37 = arith.constant 0 : index
    %c0_38 = arith.constant 0 : index
    %58 = vector.load %arg9[%c0_37, %c0_38] : memref<8x44xbf16, #tpu.memory_space<vmem>>, vector<8x40xbf16>
    %cst_39 = arith.constant dense<0.000000e+00> : vector<8x40xf32>
    %59 = tpu.matmul %57, %58, %cst_39 {dimension_numbers = #tpu.dot_dimension_numbers<[1], [0], [0], [1], [0, 0, 1, 1], [], []>} : vector<8x8xbf16>, vector<8x40xbf16>, vector<8x40xf32> -> vector<8x40xf32>
    %60 = arith.addf %55, %59 : vector<8x40xf32>
    %c1_40 = arith.constant 1 : index
    %c0_41 = arith.constant 0 : index
    %c0_42 = arith.constant 0 : index
    %61 = vector.load %arg4[%c1_40, %c0_41, %c0_42] : memref<5x8x8xbf16, #tpu.memory_space<vmem>>, vector<1x8x8xbf16>
    %62 = vector.shape_cast %61 : vector<1x8x8xbf16> to vector<8x8xbf16>
    %c0_43 = arith.constant 0 : index
    %c1_44 = arith.constant 1 : index
    %63 = vector.load %arg9[%c0_43, %c1_44] : memref<8x44xbf16, #tpu.memory_space<vmem>>, vector<8x40xbf16>
    %cst_45 = arith.constant dense<0.000000e+00> : vector<8x40xf32>
    %64 = tpu.matmul %62, %63, %cst_45 {dimension_numbers = #tpu.dot_dimension_numbers<[1], [0], [0], [1], [0, 0, 1, 1], [], []>} : vector<8x8xbf16>, vector<8x40xbf16>, vector<8x40xf32> -> vector<8x40xf32>
    %65 = arith.addf %60, %64 : vector<8x40xf32>
    %c2_46 = arith.constant 2 : index
    %c0_47 = arith.constant 0 : index
    %c0_48 = arith.constant 0 : index
    %66 = vector.load %arg4[%c2_46, %c0_47, %c0_48] : memref<5x8x8xbf16, #tpu.memory_space<vmem>>, vector<1x8x8xbf16>
    %67 = vector.shape_cast %66 : vector<1x8x8xbf16> to vector<8x8xbf16>
    %c0_49 = arith.constant 0 : index
    %c2_50 = arith.constant 2 : index
    %68 = vector.load %arg9[%c0_49, %c2_50] : memref<8x44xbf16, #tpu.memory_space<vmem>>, vector<8x40xbf16>
    %cst_51 = arith.constant dense<0.000000e+00> : vector<8x40xf32>
    %69 = tpu.matmul %67, %68, %cst_51 {dimension_numbers = #tpu.dot_dimension_numbers<[1], [0], [0], [1], [0, 0, 1, 1], [], []>} : vector<8x8xbf16>, vector<8x40xbf16>, vector<8x40xf32> -> vector<8x40xf32>
    %70 = arith.addf %65, %69 : vector<8x40xf32>
    %c3_52 = arith.constant 3 : index
    %c0_53 = arith.constant 0 : index
    %c0_54 = arith.constant 0 : index
    %71 = vector.load %arg4[%c3_52, %c0_53, %c0_54] : memref<5x8x8xbf16, #tpu.memory_space<vmem>>, vector<1x8x8xbf16>
    %72 = vector.shape_cast %71 : vector<1x8x8xbf16> to vector<8x8xbf16>
    %c0_55 = arith.constant 0 : index
    %c3_56 = arith.constant 3 : index
    %73 = vector.load %arg9[%c0_55, %c3_56] : memref<8x44xbf16, #tpu.memory_space<vmem>>, vector<8x40xbf16>
    %cst_57 = arith.constant dense<0.000000e+00> : vector<8x40xf32>
    %74 = tpu.matmul %72, %73, %cst_57 {dimension_numbers = #tpu.dot_dimension_numbers<[1], [0], [0], [1], [0, 0, 1, 1], [], []>} : vector<8x8xbf16>, vector<8x40xbf16>, vector<8x40xf32> -> vector<8x40xf32>
    %75 = arith.addf %70, %74 : vector<8x40xf32>
    %c4 = arith.constant 4 : index
    %c0_58 = arith.constant 0 : index
    %c0_59 = arith.constant 0 : index
    %76 = vector.load %arg4[%c4, %c0_58, %c0_59] : memref<5x8x8xbf16, #tpu.memory_space<vmem>>, vector<1x8x8xbf16>
    %77 = vector.shape_cast %76 : vector<1x8x8xbf16> to vector<8x8xbf16>
    %c0_60 = arith.constant 0 : index
    %c4_61 = arith.constant 4 : index
    %78 = vector.load %arg9[%c0_60, %c4_61] : memref<8x44xbf16, #tpu.memory_space<vmem>>, vector<8x40xbf16>
    %cst_62 = arith.constant dense<0.000000e+00> : vector<8x40xf32>
    %79 = tpu.matmul %77, %78, %cst_62 {dimension_numbers = #tpu.dot_dimension_numbers<[1], [0], [0], [1], [0, 0, 1, 1], [], []>} : vector<8x8xbf16>, vector<8x40xbf16>, vector<8x40xf32> -> vector<8x40xf32>
    %80 = arith.addf %75, %79 : vector<8x40xf32>
    %c0_63 = arith.constant 0 : index
    %c0_64 = arith.constant 0 : index
    %81 = vector.load %arg5[%c0_63, %c0_64] : memref<8x1xf32, #tpu.memory_space<vmem>>, vector<8x1xf32>
    %82 = vector.broadcast %81 : vector<8x1xf32> to vector<8x40xf32>
    %83 = arith.addf %80, %82 : vector<8x40xf32>
    %cst_65 = arith.constant 0.000000e+00 : f32
    %84 = vector.broadcast %cst_65 : f32 to vector<8x40xf32>
    %85 = arith.maximumf %83, %84 : vector<8x40xf32>
    %cst_66 = arith.constant 0.000000e+00 : f32
    %86 = vector.shape_cast %14 : vector<1x40xi1> to vector<1x40xi1>
    %87 = vector.broadcast %86 : vector<1x40xi1> to vector<8x40xi1>
    %88 = vector.broadcast %cst_66 : f32 to vector<8x40xf32>
    %89 = arith.select %87, %85, %88 : vector<8x40xi1>, vector<8x40xf32>
    %90 = arith.truncf %89 : vector<8x40xf32> to vector<8x40xbf16>
    %c0_67 = arith.constant 0 : index
    %c1_68 = arith.constant 1 : index
    %91 = vector.load %arg9[%c0_67, %c1_68] : memref<8x44xbf16, #tpu.memory_space<vmem>>, vector<8x40xbf16>
    tpu.vector_store %arg9[%c0_67, %c1_68], %90 {strides = array<i32>} : memref<8x44xbf16, #tpu.memory_space<vmem>>, vector<8x40xbf16>,
    %cst_69 = arith.constant 0.000000e+00 : f32
    %92 = vector.broadcast %cst_69 : f32 to vector<8x40xf32>
    %c0_70 = arith.constant 0 : index
    %c0_71 = arith.constant 0 : index
    %c0_72 = arith.constant 0 : index
    %93 = vector.load %arg6[%c0_70, %c0_71, %c0_72] : memref<3x8x8xbf16, #tpu.memory_space<vmem>>, vector<1x8x8xbf16>
    %94 = vector.shape_cast %93 : vector<1x8x8xbf16> to vector<8x8xbf16>
    %c0_73 = arith.constant 0 : index
    %c0_74 = arith.constant 0 : index
    %95 = vector.load %arg9[%c0_73, %c0_74] : memref<8x44xbf16, #tpu.memory_space<vmem>>, vector<8x40xbf16>
    %cst_75 = arith.constant dense<0.000000e+00> : vector<8x40xf32>
    %96 = tpu.matmul %94, %95, %cst_75 {dimension_numbers = #tpu.dot_dimension_numbers<[1], [0], [0], [1], [0, 0, 1, 1], [], []>} : vector<8x8xbf16>, vector<8x40xbf16>, vector<8x40xf32> -> vector<8x40xf32>
    %97 = arith.addf %92, %96 : vector<8x40xf32>
    %c1_76 = arith.constant 1 : index
    %c0_77 = arith.constant 0 : index
    %c0_78 = arith.constant 0 : index
    %98 = vector.load %arg6[%c1_76, %c0_77, %c0_78] : memref<3x8x8xbf16, #tpu.memory_space<vmem>>, vector<1x8x8xbf16>
    %99 = vector.shape_cast %98 : vector<1x8x8xbf16> to vector<8x8xbf16>
    %c0_79 = arith.constant 0 : index
    %c1_80 = arith.constant 1 : index
    %100 = vector.load %arg9[%c0_79, %c1_80] : memref<8x44xbf16, #tpu.memory_space<vmem>>, vector<8x40xbf16>
    %cst_81 = arith.constant dense<0.000000e+00> : vector<8x40xf32>
    %101 = tpu.matmul %99, %100, %cst_81 {dimension_numbers = #tpu.dot_dimension_numbers<[1], [0], [0], [1], [0, 0, 1, 1], [], []>} : vector<8x8xbf16>, vector<8x40xbf16>, vector<8x40xf32> -> vector<8x40xf32>
    %102 = arith.addf %97, %101 : vector<8x40xf32>
    %c2_82 = arith.constant 2 : index
    %c0_83 = arith.constant 0 : index
    %c0_84 = arith.constant 0 : index
    %103 = vector.load %arg6[%c2_82, %c0_83, %c0_84] : memref<3x8x8xbf16, #tpu.memory_space<vmem>>, vector<1x8x8xbf16>
    %104 = vector.shape_cast %103 : vector<1x8x8xbf16> to vector<8x8xbf16>
    %c0_85 = arith.constant 0 : index
    %c2_86 = arith.constant 2 : index
    %105 = vector.load %arg9[%c0_85, %c2_86] : memref<8x44xbf16, #tpu.memory_space<vmem>>, vector<8x40xbf16>
    %cst_87 = arith.constant dense<0.000000e+00> : vector<8x40xf32>
    %106 = tpu.matmul %104, %105, %cst_87 {dimension_numbers = #tpu.dot_dimension_numbers<[1], [0], [0], [1], [0, 0, 1, 1], [], []>} : vector<8x8xbf16>, vector<8x40xbf16>, vector<8x40xf32> -> vector<8x40xf32>
    %107 = arith.addf %102, %106 : vector<8x40xf32>
    %c0_88 = arith.constant 0 : index
    %c0_89 = arith.constant 0 : index
    %108 = vector.load %arg7[%c0_88, %c0_89] : memref<8x1xf32, #tpu.memory_space<vmem>>, vector<8x1xf32>
    %109 = vector.broadcast %108 : vector<8x1xf32> to vector<8x40xf32>
    %110 = arith.addf %107, %109 : vector<8x40xf32>
    %111 = arith.addf %110, %52 : vector<8x40xf32>
    %cst_90 = arith.constant 0.000000e+00 : f32
    %112 = vector.broadcast %cst_90 : f32 to vector<8x40xf32>
    %113 = arith.maximumf %111, %112 : vector<8x40xf32>
    %114 = arith.truncf %113 : vector<8x40xf32> to vector<8x40xbf16>
    %c0_91 = arith.constant 0 : index
    %c0_92 = arith.constant 0 : index
    %c0_93 = arith.constant 0 : index
    %115 = vector.load %arg8[%c0_91, %c0_92, %c0_93] : memref<1x8x40xbf16, #tpu.memory_space<vmem>>, vector<1x8x40xbf16>
    %116 = vector.shape_cast %115 : vector<1x8x40xbf16> to vector<8x40xbf16>
    %117 = vector.shape_cast %114 : vector<8x40xbf16> to vector<1x8x40xbf16>
    tpu.vector_store %arg8[%c0_91, %c0_92, %c0_93], %117 {strides = array<i32>} : memref<1x8x40xbf16, #tpu.memory_space<vmem>>, vector<1x8x40xbf16>,
    return
  }
  func.func @transform_0(%arg0: i32) -> (i32, i32, i32) {
    %c0_i32 = arith.constant 0 : i32
    %c0_i32_0 = arith.constant 0 : i32
    %c0_i32_1 = arith.constant 0 : i32
    return %arg0, %c0_i32, %c0_i32_0 : i32, i32, i32
  }
  func.func @transform_1(%arg0: i32) -> (i32, i32, i32) {
    %c0_i32 = arith.constant 0 : i32
    %c0_i32_0 = arith.constant 0 : i32
    %c0_i32_1 = arith.constant 0 : i32
    %c0_i32_2 = arith.constant 0 : i32
    return %c0_i32, %c0_i32_0, %c0_i32_1 : i32, i32, i32
  }
  func.func @transform_2(%arg0: i32) -> (i32, i32) {
    %c0_i32 = arith.constant 0 : i32
    %c0_i32_0 = arith.constant 0 : i32
    %c0_i32_1 = arith.constant 0 : i32
    return %c0_i32, %c0_i32_0 : i32, i32
  }
  func.func @transform_3(%arg0: i32) -> (i32, i32, i32) {
    %c0_i32 = arith.constant 0 : i32
    %c0_i32_0 = arith.constant 0 : i32
    %c0_i32_1 = arith.constant 0 : i32
    %c0_i32_2 = arith.constant 0 : i32
    return %c0_i32, %c0_i32_0, %c0_i32_1 : i32, i32, i32
  }
  func.func @transform_4(%arg0: i32) -> (i32, i32) {
    %c0_i32 = arith.constant 0 : i32
    %c0_i32_0 = arith.constant 0 : i32
    %c0_i32_1 = arith.constant 0 : i32
    return %c0_i32, %c0_i32_0 : i32, i32
  }
  func.func @transform_5(%arg0: i32) -> (i32, i32, i32) {
    %c0_i32 = arith.constant 0 : i32
    %c0_i32_0 = arith.constant 0 : i32
    %c0_i32_1 = arith.constant 0 : i32
    %c0_i32_2 = arith.constant 0 : i32
    return %c0_i32, %c0_i32_0, %c0_i32_1 : i32, i32, i32
  }
  func.func @transform_6(%arg0: i32) -> (i32, i32) {
    %c0_i32 = arith.constant 0 : i32
    %c0_i32_0 = arith.constant 0 : i32
    %c0_i32_1 = arith.constant 0 : i32
    return %c0_i32, %c0_i32_0 : i32, i32
  }
  func.func @transform_7(%arg0: i32) -> (i32, i32, i32) {
    %c0_i32 = arith.constant 0 : i32
    %c0_i32_0 = arith.constant 0 : i32
    %c0_i32_1 = arith.constant 0 : i32
    return %arg0, %c0_i32, %c0_i32_0 : i32, i32, i32
  }
}

</mosaic_0001>

<bundles_post_ra>
// kernel: tpu_custom_call.1
= control target key start
LH: loop header
LB: loop body
LE: loop exit
PB: predicated region body
PF: predicated region fallthrough
CT: control target
= control target key end

     0   :  { %s1014_s28 = smov 127   ;;  %v1015_v4 = vmov 0.0   ;;  %vm1016_vm0 = vmmov 0   ;;  %s1237_s0 = inlined_call_operand.vmem [shape: bf16[1,64,43], index: 0, kind: input, shape index: {}]   ;;  %s1238_s1 = inlined_call_operand.vmem [shape: bf16[4,16,64], index: 1, kind: input, shape index: {}]   ;;  %s1239_s2 = inlined_call_operand.vmem [shape: f32[16,1], index: 2, kind: input, shape index: {}]   ;;  %s1240_s3 = inlined_call_operand.vmem [shape: bf16[5,8,8], index: 3, kind: input, shape index: {}]   ;;  %s1241_s4 = inlined_call_operand.vmem [shape: f32[8,1], index: 4, kind: input, shape index: {}]   ;;  %s1242_s5 = inlined_call_operand.vmem [shape: bf16[3,8,8], index: 5, kind: input, shape index: {}]   ;;  %s1243_s6 = inlined_call_operand.vmem [shape: f32[8,1], index: 6, kind: input, shape index: {}]   ;;  %s1244_s7 = inlined_call_operand.hbm [shape: bf16[1,8,40], index: 7, kind: output, shape index: {}]  }
   0x1   :  { %v982_v0 = vld [vmem:[%s1237_s0 + $0x18] sm:$0xff]   ;;  %v983_v1 = vld [vmem:[%s1237_s0 + $0x10] sm:$0xff]   ;;  %v984_v2 = vld [vmem:[%s1237_s0 + $0x8] sm:$0xff]   ;;  %886 = vmatprep.subr.bf16.mxu1 %v1015_v4  ;;  %874 = vmatprep.subr.bf16.mxu0 %v1015_v4 }
   0x2   :  { %85 = vrot.lane.b32.xlu0 %v982_v0, %s1014_s28  ;;  %81 = vrot.lane.b32.xlu1 %v984_v2, %s1014_s28  ;;  %v985_v3 = vld [vmem:[%s1237_s0] sm:$0xff]  }
   0x3   :  { %887 = vmatpush3.bf16.msra.mxu1 %v982_v0  ;;  %894 = vmatprep.mubr.msk.bf16.mxu1 %vm1016_vm0, %v1015_v4 }
   0x4   :  { %888 = vmatprep.subr.bf16.mxu1 %v1015_v4  ;;  %882 = vmatprep.mubr.msk.bf16.mxu0 %vm1016_vm0, %v1015_v4 }
   0x6   :  { %83 = vrot.lane.b32.xlu0 %v983_v1, %s1014_s28 }
   0x7   :  { %12 = vsyncpa [#allocation4], 0  ;;  %79 = vrot.lane.b32.xlu1 %v985_v3, %s1014_s28  ;;  %889 = vmatpush3.bf16.msra.mxu1 %v983_v1  ;;  %s1017_s0 = smov 126   ;;  %s1018_s10 = smov 125   ;;  %v986_v5 = vld [vmem:[%s1238_s1] sm:$0xff]   ;;  %vm91_vm1 = vcmask 523264   ;;  %v28_v31 = vlaneseq }
   0x8   :  { %890 = vmatprep.subr.bf16.mxu1 %v1015_v4  ;;  %v1019_v6 = vmov 0   ;;  %v321_v7 = vld [vmem:[%s1239_s2] sm:$0xff]  ;;  %v987_v14 = vld [vmem:[%s1238_s1 + $0x8] sm:$0xff]   ;;  %v988_v20 = vld [vmem:[%s1238_s1 + $0x18] sm:$0xff]   ;;  %vm39_vm2 = vcmask 355328   ;;  %vm346_vm10 = vcmask 338960  }
   0x9   :  { %980 = vset.pattern.permute.xlu0 %v1019_v6  ;;  %981 = vset.pattern.permute.xlu1 %v1019_v6  ;;  %v989_v22 = vld [vmem:[%s1238_s1 + $0x10] sm:$0xff]   ;;  %40 = vst.msk [vmem:[#allocation2] sm:$0xf] %vm39_vm2, %v1019_v6  ;;  %v29_v33 = vand.u32 127, %v28_v31  ;;  %s1020_s1 = smov 2   ;;  %vm361_vm11 = vcmask 1043456  }
   0xa   :  { %203 = vrot.lane.b32.xlu0 %v982_v0, %s1017_s0  ;;  %vm357_vm12 = vcmask 64512   ;;  %v348_v58 = vld [vmem:[%s1240_s3] sm:$0xf]  ;;  %s1021_s23 = smov 124   ;;  %v819_v63 = vld [vmem:[%s1240_s3 + $0x4] sm:$0xf] }
   0xb   :  { %269 = vrot.lane.b32.xlu1 %v982_v0, %s1018_s10  ;;  %891 = vmatpush3.bf16.msra.mxu1 %v984_v2  ;;  %vm31_vm3 = vcmp.ge.s32.totalorder %v29_v33, 2  ;;  %vm32_vm4 = vcmp.lt.s32.totalorder %v29_v33, 18  ;;  %vm35_vm5 = vcmp.ge.s32.totalorder %v29_v33, 22  ;;  %vm36_vm6 = vcmp.lt.s32.totalorder %v29_v33, 38  ;;  %v604_v59 = vld [vmem:[%s1241_s4] sm:$0xff] }
   0xc   :  { %892 = vmatprep.subr.bf16.mxu1 %v1015_v4  ;;  %vm1137_vm7 = vmand %vm31_vm3, %vm32_vm4  ;;  %v823_v6 = vld [vmem:[%s1240_s3 + $0x8] sm:$0xf]  ;;  %vm620_vm13 = vcmask 330760   ;;  %v774_v42 = vld [vmem:[%s1243_s6] sm:$0xff]  ;;  %vm784_vm14 = vcmask 322560  }
   0xd   :  { %vm1141_vm8 = vmand %vm35_vm5, %vm36_vm6 }
   0xe   :  { %201 = vrot.lane.b32.xlu0 %v983_v1, %s1017_s0  ;;  %vm38_vm9 = vmor %vm1137_vm7, %vm1141_vm8 }
   0xf   :  { %267 = vrot.lane.b32.xlu1 %v983_v1, %s1018_s10  ;;  %893 = vmatpush3.bf16.msra.mxu1 %v985_v3 }
  0x10   :  { %910 = vmatprep.subr.bf16.mxu1 %v1015_v4 }
  0x12   :  { %199 = vrot.lane.b32.xlu0 %v984_v2, %s1017_s0  ;;  %895 = vmatmul.mubr.msk.bf16.vlgmr.msra.gmra.mxu1 %vm91_vm1, %v986_v5 }
  0x13   :  { %265 = vrot.lane.b32.xlu1 %v984_v2, %s1018_s10  ;;  %918 = vmatprep.mubr.msk.bf16.mxu1 %vm1016_vm0, %v1015_v4 }
  0x16   :  { %197 = vrot.lane.b32.xlu0 %v985_v3, %s1017_s0 }
  0x17   :  { %263 = vrot.lane.b32.xlu1 %v985_v3, %s1018_s10  ;;  %v825_v3 = vld [vmem:[%s1240_s3 + $0xc] sm:$0xf] }
  0x1a   :  { %325 = vperm.xlu0 %980, %v321_v7  }
  0x74   :  { %v86_v8 = vpop.permute.xlu0 %85  ;;  %v82_v9 = vpop.permute.xlu1 %81 }
  0x75   :  { %875 = vmatpush3.bf16.msra.mxu0 %v86_v8  ;;  %v827_v8 = vld [vmem:[%s1240_s3 + $0x10] sm:$0xf]  ;;  %s1022_s3 = smov 1  }
  0x76   :  { %876 = vmatprep.subr.bf16.mxu0 %v1015_v4 }
  0x78   :  { %v84_v10 = vpop.permute.xlu0 %83 }
  0x79   :  { %877 = vmatpush3.bf16.msra.mxu0 %v84_v10  ;;  %v80_v11 = vpop.permute.xlu1 %79 }
  0x7a   :  { %878 = vmatprep.subr.bf16.mxu0 %v1015_v4 }
  0x7c   :  { %v204_v12 = vpop.permute.xlu0 %203 }
  0x7d   :  { %879 = vmatpush3.bf16.msra.mxu0 %v82_v9  ;;  %v270_v13 = vpop.permute.xlu1 %269 }
  0x7e   :  { %880 = vmatprep.subr.bf16.mxu0 %v1015_v4  ;;  %911 = vmatpush3.bf16.msra.mxu1 %v270_v13 }
  0x7f   :  { %912 = vmatprep.subr.bf16.mxu1 %v1015_v4 }
  0x80   :  { %v202_v16 = vpop.permute.xlu0 %201 }
  0x81   :  { %881 = vmatpush3.bf16.msra.mxu0 %v80_v11  ;;  %v268_v15 = vpop.permute.xlu1 %267 }
  0x82   :  { %898 = vmatprep.subr.bf16.mxu0 %v1015_v4  ;;  %913 = vmatpush3.bf16.msra.mxu1 %v268_v15 }
  0x83   :  { %914 = vmatprep.subr.bf16.mxu1 %v1015_v4 }
  0x84   :  { %883 = vmatmul.mubr.msk.bf16.vlgmr.msra.gmra.mxu0 %vm91_vm1, %v987_v14  ;;  %v200_v18 = vpop.permute.xlu0 %199 }
  0x85   :  { %899 = vmatpush3.bf16.msra.mxu0 %v204_v12  ;;  %906 = vmatprep.mubr.msk.bf16.mxu0 %vm1016_vm0, %v1015_v4  ;;  %v266_v17 = vpop.permute.xlu1 %265 }
  0x86   :  { %900 = vmatprep.subr.bf16.mxu0 %v1015_v4  ;;  %915 = vmatpush3.bf16.msra.mxu1 %v266_v17 }
  0x87   :  { %916 = vmatprep.subr.bf16.mxu1 %v1015_v4 }
  0x88   :  { %v198_v21 = vpop.permute.xlu0 %197 }
  0x89   :  { %901 = vmatpush3.bf16.msra.mxu0 %v202_v16  ;;  %v264_v19 = vpop.permute.xlu1 %263 }
  0x8a   :  { %902 = vmatprep.subr.bf16.mxu0 %v1015_v4  ;;  %917 = vmatpush3.bf16.msra.mxu1 %v264_v19 }
  0x8b   :  { %928 = vmatprep.subr.bf16.mxu1 %v1015_v4 }
  0x8d   :  { %903 = vmatpush3.bf16.msra.mxu0 %v200_v18  ;;  %919 = vmatmul.mubr.msk.bf16.vlgmr.msra.gmra.mxu1 %vm91_vm1, %v988_v20 }
  0x8e   :  { %904 = vmatprep.subr.bf16.mxu0 %v1015_v4  ;;  %930 = vmatprep.mubr.msk.bf16.mxu1 %vm1016_vm0, %v1015_v4 }
  0x91   :  { %905 = vmatpush3.bf16.msra.mxu0 %v198_v21 }
  0x92   :  { %922 = vmatprep.subr.bf16.mxu0 %v1015_v4 }
  0x94   :  { %907 = vmatmul.mubr.msk.bf16.vlgmr.msra.gmra.mxu0 %vm91_vm1, %v989_v22 }
  0x95   :  { %924 = vmatprep.mubr.msk.bf16.mxu0 %vm1016_vm0, %v1015_v4  ;;  %v326_v41 = vpop.permute.xlu0 %325 }
  0xd2   :  { %v182_v23 = vpop.f32.mrf.mxu1 }
  0xd4   :  { %v896_v24 = vpop.f32.mrf.mxu1 }
  0xd6   :  { %v185_v25 = vpop.f32.mrf.mxu1 }
  0xd8   :  { %v897_v26 = vpop.f32.mrf.mxu1 }
 0x144   :  { %v129_v27 = vpop.f32.mrf.mxu0 }
 0x145   :  { %v183_v36 = vadd.f32 %v182_v23, %v129_v27 }
 0x146   :  { %v884_v28 = vpop.f32.mrf.mxu0 }
 0x148   :  { %v132_v29 = vpop.f32.mrf.mxu0 }
 0x149   :  { %v186_v43 = vadd.f32 %v185_v25, %v132_v29 }
 0x14a   :  { %v885_v30 = vpop.f32.mrf.mxu0 }
 0x14d   :  { %v312_v32 = vpop.f32.mrf.mxu1 }
 0x14f   :  { %v920_v34 = vpop.f32.mrf.mxu1 }
 0x151   :  { %v315_v35 = vpop.f32.mrf.mxu1 }
 0x153   :  { %v921_v38 = vpop.f32.mrf.mxu1 }
 0x154   :  { %v246_v37 = vpop.f32.mrf.mxu0 }
 0x155   :  { %v253_v39 = vadd.f32 %v246_v37, %v183_v36 }
 0x156   :  { %v908_v40 = vpop.f32.mrf.mxu0 }
 0x157   :  { %v319_v44 = vadd.f32 %v312_v32, %v253_v39 }
 0x158   :  { %v249_v46 = vpop.f32.mrf.mxu0 }
 0x159   :  { %v254_v47 = vadd.f32 %v249_v46, %v186_v43  ;;  %v333_v48 = vadd.f32 %v326_v41, %v319_v44  ;;  %v622_v43 = vld [vmem:[%s1242_s5] sm:$0xf]  ;;  %v322_v44 = vld [vmem:[%s1239_s2 + $0x8] sm:$0xff] }
 0x15a   :  { %v909_v49 = vpop.f32.mrf.mxu0 }
 0x15b   :  { %v335_v50 = vmax.f32 %v333_v48, 0.0  ;;  %v1149_v51 = vadd.f32 %v315_v35, %v254_v47  ;;  %v830_v48 = vld [vmem:[%s1242_s5 + $0x4] sm:$0xf] }
 0x15d   :  { %v338_v52 = vsel %vm38_vm9, %v335_v50, 0.0  ;;  %v834_v50 = vld [vmem:[%s1242_s5 + $0x8] sm:$0xf]  ;;  %s1023_s5 = smov [#allocation3]  }
 0x15e   :  { %v836_v53 = vpack.c.bf16 %v338_v52, %v338_v52 }
 0x160   :  { %343 = vrot.lane.b32.xlu1 %v836_v53, %s1020_s1 }
 0x1d2   :  { %v344_v54 = vpop.permute.xlu1 %343 }
 0x1d3   :  { %347 = vst.msk [vmem:[#allocation2] sm:$0xf] %vm346_vm10, %v344_v54 }
 0x1da   :  { %v349_v55 = vld [vmem:[#allocation2] sm:$0xf] }
 0x1db   :  { %v409_v56 = vsel %vm361_vm11, %v349_v55, 0  ;;  %v820_v57 = vcombine.low %v349_v55, %v349_v55 }
 0x1dc   :  { %929 = vmatpush3.bf16.msra.mxu1 %v409_v56 }
 0x1dd   :  { %453 = vrot.lane.b32.xlu0 %v820_v57, %s1017_s0  ;;  %355 = vrot.lane.b32.xlu1 %v820_v57, %s1014_s28 }
 0x1de   :  { %940 = vmatprep.subr.bf16.mxu1 %v1015_v4 }
 0x1df   :  { %931 = vmatmul.mubr.msk.bf16.vlgmr.msra.gmra.mxu1 %vm357_vm12, %v348_v58 }
 0x1e0   :  { %942 = vmatprep.mubr.msk.bf16.mxu1 %vm1016_vm0, %v1015_v4 }
 0x1e1   :  { %555 = vrot.lane.b32.xlu0 %v820_v57, %s1021_s23  ;;  %504 = vrot.lane.b32.xlu1 %v820_v57, %s1018_s10 }
 0x1e5   :  { %607 = vperm.xlu1 %981, %v604_v59  }
 0x24f   :  { %v356_v60 = vpop.permute.xlu1 %355  ;;  %v454_v62 = vpop.permute.xlu0 %453 }
 0x250   :  { %v363_v61 = vsel %vm361_vm11, %v356_v60, 0  ;;  %v459_v1 = vsel %vm361_vm11, %v454_v62, 0 }
 0x251   :  { %923 = vmatpush3.bf16.msra.mxu0 %v363_v61 }
 0x252   :  { %934 = vmatprep.subr.bf16.mxu0 %v1015_v4 }
 0x253   :  { %v505_v0 = vpop.permute.xlu1 %504  ;;  %v556_v5 = vpop.permute.xlu0 %555 }
 0x254   :  { %v510_v2 = vsel %vm361_vm11, %v505_v0, 0  ;;  %925 = vmatmul.mubr.msk.bf16.vlgmr.msra.gmra.mxu0 %vm357_vm12, %v819_v63  ;;  %v561_v7 = vsel %vm361_vm11, %v556_v5, 0 }
 0x255   :  { %935 = vmatpush3.bf16.msra.mxu0 %v459_v1  ;;  %941 = vmatpush3.bf16.msra.mxu1 %v510_v2 }
 0x256   :  { %936 = vmatprep.mubr.msk.bf16.mxu0 %vm1016_vm0, %v1015_v4  ;;  %946 = vmatprep.subr.bf16.mxu0 %v1015_v4 }
 0x257   :  { %952 = vmatprep.subr.bf16.mxu1 %v1015_v4 }
 0x258   :  { %943 = vmatmul.mubr.msk.bf16.vlgmr.msra.gmra.mxu1 %vm357_vm12, %v825_v3 }
 0x259   :  { %954 = vmatprep.mubr.msk.bf16.mxu1 %vm1016_vm0, %v1015_v4 }
 0x25c   :  { %937 = vmatmul.mubr.msk.bf16.vlgmr.msra.gmra.mxu0 %vm357_vm12, %v823_v6 }
 0x25d   :  { %947 = vmatpush3.bf16.msra.mxu0 %v561_v7  ;;  %948 = vmatprep.mubr.msk.bf16.mxu0 %vm1016_vm0, %v1015_v4 }
 0x25e   :  { %958 = vmatprep.subr.bf16.mxu0 %v1015_v4 }
 0x260   :  { %v608_v29 = vpop.permute.xlu1 %607 }
 0x264   :  { %949 = vmatmul.mubr.msk.bf16.vlgmr.msra.gmra.mxu0 %vm357_vm12, %v827_v8 }
 0x265   :  { %960 = vmatprep.mubr.msk.bf16.mxu0 %vm1016_vm0, %v1015_v4 }
 0x29f   :  { %v445_v9 = vpop.f32.mrf.mxu1 }
 0x2a1   :  { %v932_v10 = vpop.f32.mrf.mxu1 }
 0x2a3   :  { %v448_v11 = vpop.f32.mrf.mxu1 }
 0x2a5   :  { %v933_v12 = vpop.f32.mrf.mxu1 }
 0x314   :  { %v399_v13 = vpop.f32.mrf.mxu0 }
 0x315   :  { %v446_v21 = vadd.f32 %v445_v9, %v399_v13 }
 0x316   :  { %v926_v14 = vpop.f32.mrf.mxu0 }
 0x318   :  { %v402_v15 = vpop.f32.mrf.mxu0  ;;  %v546_v16 = vpop.f32.mrf.mxu1 }
 0x31a   :  { %v927_v17 = vpop.f32.mrf.mxu0  ;;  %v944_v18 = vpop.f32.mrf.mxu1 }
 0x31c   :  { %v495_v19 = vpop.f32.mrf.mxu0  ;;  %v549_v20 = vpop.f32.mrf.mxu1 }
 0x31d   :  { %v501_v24 = vadd.f32 %v495_v19, %v446_v21 }
 0x31e   :  { %v938_v22 = vpop.f32.mrf.mxu0  ;;  %v945_v23 = vpop.f32.mrf.mxu1 }
 0x31f   :  { %v552_v27 = vadd.f32 %v546_v16, %v501_v24 }
 0x320   :  { %v498_v25 = vpop.f32.mrf.mxu0 }
 0x322   :  { %v939_v26 = vpop.f32.mrf.mxu0 }
 0x324   :  { %v597_v28 = vpop.f32.mrf.mxu0 }
 0x325   :  { %v603_v30 = vadd.f32 %v597_v28, %v552_v27 }
 0x326   :  { %v950_v31 = vpop.f32.mrf.mxu0 }
 0x327   :  { %v610_v32 = vadd.f32 %v608_v29, %v603_v30 }
 0x328   :  { %v600_v33 = vpop.f32.mrf.mxu0 }
 0x329   :  { %v611_v34 = vmax.f32 %v610_v32, 0.0 }
 0x32a   :  { %v951_v35 = vpop.f32.mrf.mxu0 }
 0x32b   :  { %v612_v36 = vsel %vm38_vm9, %v611_v34, 0.0 }
 0x32c   :  { %v837_v37 = vpack.c.bf16 %v612_v36, %v612_v36 }
 0x32e   :  { %617 = vrot.lane.b32.xlu0 %v837_v37, %s1022_s3 }
 0x3a0   :  { %v618_v38 = vpop.permute.xlu0 %617 }
 0x3a1   :  { %621 = vst.msk [vmem:[#allocation2] sm:$0xf] %vm620_vm13, %v618_v38 }
 0x3a8   :  { %v623_v39 = vld [vmem:[#allocation2] sm:$0xf] }
 0x3a9   :  { %v681_v40 = vsel %vm361_vm11, %v623_v39, 0  ;;  %v831_v41 = vcombine.low %v623_v39, %v623_v39 }
 0x3aa   :  { %959 = vmatpush3.bf16.msra.mxu0 %v681_v40 }
 0x3ab   :  { %725 = vrot.lane.b32.xlu0 %v831_v41, %s1017_s0  ;;  %629 = vrot.lane.b32.xlu1 %v831_v41, %s1014_s28  ;;  %s792_s28 = sshll.u32 %s1023_s5, 4  ;;  %s793_s28 = int_to_ptr.vmem [resolvable:$true] %s792_s28 }
 0x3ac   :  { %s992_s18 = scalar_lea.vmem %s793_s28, 64  ;;  %p997_p1 = scmp.lt.s32.totalorder %s793_s28, %s793_s28 }
 0x3ad   :  { %961 = vmatmul.mubr.msk.bf16.vlgmr.msra.gmra.mxu0 %vm357_vm12, %v622_v43  ;;  %p993_p0 = scmp.ne.s32.totalorder %s793_s28, %s992_s18  ;;  %p998_p2 = scmp.lt.s32.totalorder %s992_s18, %s992_s18 }
 0x3af   :  { %777 = vperm.xlu0 %980, %v774_v42   ;;  %330 = vperm.xlu1 %981, %v322_v44   ;;  %p999_p3 = por %p998_p2, %p997_p1 }
 0x3b1   :  { %p1000_p4 = pnand %p999_p3, %p993_p0 }
 0x41d   :  { %v630_v45 = vpop.permute.xlu1 %629  ;;  %v726_v47 = vpop.permute.xlu0 %725 }
 0x41e   :  { %v635_v46 = vsel %vm361_vm11, %v630_v45, 0  ;;  %v731_v49 = vsel %vm361_vm11, %v726_v47, 0 }
 0x41f   :  { %953 = vmatpush3.bf16.msra.mxu1 %v635_v46 }
 0x420   :  { %964 = vmatprep.subr.bf16.mxu1 %v1015_v4 }
 0x422   :  { %955 = vmatmul.mubr.msk.bf16.vlgmr.msra.gmra.mxu1 %vm357_vm12, %v830_v48 }
 0x423   :  { %965 = vmatpush3.bf16.msra.mxu1 %v731_v49  ;;  %966 = vmatprep.mubr.msk.bf16.mxu1 %vm1016_vm0, %v1015_v4 }
 0x42a   :  { %967 = vmatmul.mubr.msk.bf16.vlgmr.msra.gmra.mxu1 %vm357_vm12, %v834_v50  ;;  %v331_v61 = vpop.permute.xlu1 %330  ;;  %v778_v0 = vpop.permute.xlu0 %777 }
 0x42b   :  { %v334_v1 = vadd.f32 %v331_v61, %v1149_v51 }
 0x46d   :  { %v717_v52 = vpop.f32.mrf.mxu0 }
 0x46f   :  { %v962_v53 = vpop.f32.mrf.mxu0 }
 0x471   :  { %v720_v54 = vpop.f32.mrf.mxu0 }
 0x473   :  { %v963_v55 = vpop.f32.mrf.mxu0 }
 0x4e2   :  { %v671_v56 = vpop.f32.mrf.mxu1 }
 0x4e3   :  { %v718_v60 = vadd.f32 %v717_v52, %v671_v56 }
 0x4e4   :  { %v956_v57 = vpop.f32.mrf.mxu1 }
 0x4e6   :  { %v674_v58 = vpop.f32.mrf.mxu1 }
 0x4e8   :  { %v957_v59 = vpop.f32.mrf.mxu1 }
 0x4ea   :  { %v767_v62 = vpop.f32.mrf.mxu1 }
 0x4eb   :  { %v773_v63 = vadd.f32 %v767_v62, %v718_v60 }
 0x4ec   :  { %v968_v4 = vpop.f32.mrf.mxu1 }
 0x4ed   :  { %v780_v2 = vadd.f32 %v778_v0, %v773_v63 }
 0x4ee   :  { %v770_v3 = vpop.f32.mrf.mxu1 }
 0x4ef   :  { %v781_v5 = vadd.f32 %v780_v2, %v334_v1 }
 0x4f0   :  { %v969_v6 = vpop.f32.mrf.mxu1 }
 0x4f1   :  { %v782_v7 = vmax.f32 %v781_v5, 0.0 }
 0x4f3   :  { %v783_v8 = vpack.c.bf16 %v782_v7, %v782_v7 }
 0x4f5   :  { %785 = vst.msk [vmem:[#allocation3] sm:$0xf] %vm784_vm14, %v783_v8 }
 0x4f6   :  { %1003 = shalt.err (!%p1000_p4)
}
 0x4f7   :  { %795 = dma.vmem_to_hbm [thread:$0]  %s793_s28, 64, %s1244_s7, [#allocation4]  }
 0x4f8   :  { %1012 = dma.done.wait [#allocation4], 64  }
 0x4f9   :  { %1013 = vsyncadd [#allocation4], 4294967232 }
 0x4fa   :  { %799 = vsyncpa [#allocation4], 1 }

</bundles_post_ra>
